<compile_context>
chip_gen: v5e
topology: v5e:2x2
jax: 0.10.0
libtpu: 0.0.40
codegen_flags: <defaults>
</compile_context>

<pallas_src>
import jax
import jax.numpy as jnp
import numpy as np
from jax.experimental import pallas as pl
from jax.experimental.pallas import tpu as pltpu

PROJ_DIM = 64     # logical: SelfAttention.projection = Linear(H, 64) -> ReLU -> Linear(64, 1)
PROJ_PAD = 128    # lane-dense padding of the 64-wide projection (padded columns are zero)


# ----------------------------------------------------------------------------
# Fused kernel: projection MLP + masked softmax over time + context vector.
# ----------------------------------------------------------------------------
def self_attention_kernel(x_ref, mask_ref, w1_ref, b1_ref, w2_ref, b2_ref, out_ref):
    tb, T, H = x_ref.shape
    x = x_ref[...]                                                       # (tb, T, H) bf16

    # Linear(H, 64 -> padded 128) + ReLU: one MXU matmul over all tb*T rows.
    # T is padded to a multiple of 8 in the wrapper so this reshape is a pure view.
    x2d = x.reshape(tb * T, H)
    h = jnp.dot(x2d, w1_ref[...], preferred_element_type=jnp.float32)    # (tb*T, 128) f32
    h = jnp.maximum(h + b1_ref[...], 0.0).reshape(tb, T, PROJ_PAD)

    # Linear(64, 1): an N=1 matmul is MXU-hostile -> VPU multiply + lane reduce (f32).
    energy = jnp.sum(h * w2_ref[...], axis=-1) + b2_ref[0, 0]            # (tb, T) f32

    # Masked softmax over time in f32 (matches masked_fill(~mask, -1e9); an all-False row
    # degrades to uniform weights like the PyTorch reference, no NaN).
    valid = mask_ref[...] > 0
    energy = jnp.where(valid, energy, -1e9)
    m = jnp.max(energy, axis=-1, keepdims=True)
    e = jnp.exp(energy - m)
    weights = e / jnp.sum(e, axis=-1, keepdims=True)                     # (tb, T) f32

    # context = sum_t weights * encoder_outputs: VPU/XLU weighted sum (avoids q=1 matmul).
    ctx = jnp.sum(weights[:, :, None] * x.astype(jnp.float32), axis=1)   # (tb, H) f32
    out_ref[...] = ctx                                                   # lane-dense output block


# ----------------------------------------------------------------------------
# Tiling helpers + host wrapper.
# ----------------------------------------------------------------------------
def _round_up(v, m):
    return -(-v // m) * m


def _pick_tile_b(B, T_pad, H):
    """Batch tile: as large as a ~20 MiB x-path VMEM budget allows (multiple of 8), split into
    >= 2 roughly equal tiles when possible so v7x's two TensorCores both get work."""
    b8 = _round_up(max(B, 1), 8)
    # per batch row: double-buffered bf16 x tile + f32 weighted-sum temp + f32 hproj
    per_row = T_pad * H * (2 * 2 + 4) + T_pad * PROJ_PAD * 4
    budget = 20 * 1024 * 1024
    tile = max(8, min(b8, (budget // max(per_row, 1)) // 8 * 8))
    if tile >= b8 and b8 > 8:
        tile = _round_up(b8 // 2, 8)        # prefer an even tile count for megacore sharding
    return tile


def self_attention(encoder_outputs, mask, params, *, tile_b=None):
    """encoder_outputs: (B, T, H) float; mask: (B, T) bool. Returns context (B, H) f32."""
    B, T, H = encoder_outputs.shape
    T_pad = _round_up(T, 8)
    if tile_b is None:
        tile_b = _pick_tile_b(B, T_pad, H)
    nb = pl.cdiv(B, tile_b)
    B_pad = nb * tile_b

    # Stream activations as bf16 (halves HBM traffic); all reductions accumulate in f32.
    x = encoder_outputs.astype(jnp.bfloat16)
    m = mask.astype(jnp.int32)
    if B_pad != B or T_pad != T:
        # Padded batch rows: zero inputs + all-masked -> uniform weights over zeros -> zero ctx.
        # Padded time steps: masked out -> ~zero softmax weight.
        x = jnp.pad(x, ((0, B_pad - B), (0, T_pad - T), (0, 0)))
        m = jnp.pad(m, ((0, B_pad - B), (0, T_pad - T)))

    # Lane-pad the 64-wide projection to 128 (zero columns contribute zero energy).
    w1 = jnp.pad(params['w1'], ((0, 0), (0, PROJ_PAD - PROJ_DIM))).astype(jnp.bfloat16)
    b1 = jnp.pad(params['b1'], ((0, 0), (0, PROJ_PAD - PROJ_DIM))).astype(jnp.float32)
    w2 = jnp.pad(params['w2'], ((0, 0), (0, PROJ_PAD - PROJ_DIM))).astype(jnp.float32)
    b2 = params['b2'].astype(jnp.float32)                                # (1, 1) -> SMEM scalar

    cost = pl.CostEstimate(
        flops=2 * B_pad * T_pad * H * PROJ_PAD      # projection matmul
        + 2 * B_pad * T_pad * PROJ_PAD              # energy reduce
        + 2 * B_pad * T_pad * H,                    # weighted sum
        transcendentals=B_pad * T_pad,              # exp
        bytes_accessed=B_pad * T_pad * (H * 2 + 4) + H * PROJ_PAD * 2 + B_pad * H * 4,
    )

    out = pl.pallas_call(
        self_attention_kernel,
        out_shape=jax.ShapeDtypeStruct((B_pad, H), jnp.float32),
        grid=(nb,),
        in_specs=[
            pl.BlockSpec((tile_b, T_pad, H), lambda i: (i, 0, 0)),       # x tile (bf16)
            pl.BlockSpec((tile_b, T_pad), lambda i: (i, 0)),             # mask tile (int32)
            pl.BlockSpec((H, PROJ_PAD), lambda i: (0, 0)),               # W1 (resident, bf16)
            pl.BlockSpec((1, PROJ_PAD), lambda i: (0, 0)),               # b1 (f32)
            pl.BlockSpec((1, PROJ_PAD), lambda i: (0, 0)),               # W2 row (f32)
            pl.BlockSpec(memory_space=pltpu.MemorySpace.SMEM),           # b2 scalar in SMEM
        ],
        out_specs=pl.BlockSpec((tile_b, H), lambda i: (i, 0)),           # lane-dense output
        compiler_params=pltpu.CompilerParams(
            dimension_semantics=("parallel",),      # batch tiles -> 2nd TensorCore on v7x
            vmem_limit_bytes=48 * 1024 * 1024),     # headroom above default scoped limit
        cost_estimate=cost,
    )(x, m, w1, b1, w2, b2)
    return out[:B]


# ----------------------------------------------------------------------------
# Parameter init (PyTorch Linear-style uniform bounds) + pure-JAX reference.
# ----------------------------------------------------------------------------
def init_params(key, hidden_dim):
    k1, k2, k3, k4 = jax.random.split(key, 4)
    bound1 = 1.0 / (hidden_dim ** 0.5)
    bound2 = 1.0 / (PROJ_DIM ** 0.5)
    return {
        'w1': jax.random.uniform(k1, (hidden_dim, PROJ_DIM), jnp.float32, -bound1, bound1),
        'b1': jax.random.uniform(k2, (1, PROJ_DIM), jnp.float32, -bound1, bound1),
        'w2': jax.random.uniform(k3, (1, PROJ_DIM), jnp.float32, -bound2, bound2),
        'b2': jax.random.uniform(k4, (1, 1), jnp.float32, -bound2, bound2),
    }


def self_attention_ref(x, mask, params):
    h = jnp.maximum(x @ params['w1'] + params['b1'][0], 0.0)             # (B, T, 64)
    energy = jnp.sum(h * params['w2'][0], axis=-1) + params['b2'][0, 0]  # (B, T)
    energy = jnp.where(mask, energy, -1e9)
    w = jax.nn.softmax(energy, axis=1)
    return jnp.einsum('bt,bth->bh', w, x)


if __name__ == "__main__":
    B, T, HIDDEN = 4, 16, 128

    key = jax.random.PRNGKey(0)
    k_x, k_p = jax.random.split(key)
    x = jax.random.normal(k_x, (B, T, HIDDEN), jnp.float32)
    lens = jnp.array([16, 12, 7, 3], jnp.int32)
    mask = jnp.arange(T)[None, :] < lens[:, None]                        # (B, T) bool

    params = init_params(k_p, HIDDEN)

    out = self_attention(x, mask, params)
    out = jax.block_until_ready(out)
    assert out.shape == (B, HIDDEN) and out.dtype == jnp.float32

    ref = self_attention_ref(x, mask, params)
    np.testing.assert_allclose(np.asarray(out), np.asarray(ref), rtol=2e-2, atol=2e-2)
    print("KERNEL_OK")
</pallas_src>

<mosaic_0001>
module attributes {stable_mosaic.version = 11 : i64} {
  func.func @self_attention_kernel(%arg0: i32, %arg1: memref<8x16x128xbf16, #tpu.memory_space<vmem>>, %arg2: memref<8x16xi32, #tpu.memory_space<vmem>>, %arg3: memref<128x128xbf16, #tpu.memory_space<vmem>>, %arg4: memref<1x128xf32, #tpu.memory_space<vmem>>, %arg5: memref<1x128xf32, #tpu.memory_space<vmem>>, %arg6: memref<1x1xf32, #tpu.memory_space<smem>>, %arg7: memref<8x128xf32, #tpu.memory_space<vmem>>) attributes {dimension_semantics = [#tpu.dimension_semantics<parallel>], iteration_bounds = array<i64: 1>, scalar_prefetch = 0 : i64, scratch_operands = 0 : i64, tpu.core_type = #tpu.core_type<tc>, window_params = [{transform_indices = @transform_0, window_bounds = array<i64: 8, 16, 128>}, {transform_indices = @transform_1, window_bounds = array<i64: 8, 16>}, {pipeline_mode = #tpu.pipeline_mode<synchronous>, transform_indices = @transform_2, window_bounds = array<i64: 128, 128>}, {pipeline_mode = #tpu.pipeline_mode<synchronous>, transform_indices = @transform_3, window_bounds = array<i64: 1, 128>}, {pipeline_mode = #tpu.pipeline_mode<synchronous>, transform_indices = @transform_4, window_bounds = array<i64: 1, 128>}, {transform_indices = @transform_5, window_bounds = array<i64: 1, 1>}, {transform_indices = @transform_6, window_bounds = array<i64: 8, 128>}]} {
    %c0 = arith.constant 0 : index
    %c0_0 = arith.constant 0 : index
    %c0_1 = arith.constant 0 : index
    %0 = vector.load %arg1[%c0, %c0_0, %c0_1] : memref<8x16x128xbf16, #tpu.memory_space<vmem>>, vector<8x16x128xbf16>
    %1 = vector.shape_cast %0 : vector<8x16x128xbf16> to vector<128x128xbf16>
    %c0_2 = arith.constant 0 : index
    %c0_3 = arith.constant 0 : index
    %2 = vector.load %arg3[%c0_2, %c0_3] : memref<128x128xbf16, #tpu.memory_space<vmem>>, vector<128x128xbf16>
    %cst = arith.constant dense<0.000000e+00> : vector<128x128xf32>
    %3 = tpu.matmul %1, %2, %cst {dimension_numbers = #tpu.dot_dimension_numbers<[1], [0], [0], [1], [0, 0, 1, 1], [], []>} : vector<128x128xbf16>, vector<128x128xbf16>, vector<128x128xf32> -> vector<128x128xf32>
    %c0_4 = arith.constant 0 : index
    %c0_5 = arith.constant 0 : index
    %4 = vector.load %arg4[%c0_4, %c0_5] : memref<1x128xf32, #tpu.memory_space<vmem>>, vector<1x128xf32>
    %5 = vector.broadcast %4 : vector<1x128xf32> to vector<128x128xf32>
    %6 = arith.addf %3, %5 : vector<128x128xf32>
    %cst_6 = arith.constant 0.000000e+00 : f32
    %7 = vector.broadcast %cst_6 : f32 to vector<128x128xf32>
    %8 = arith.maximumf %6, %7 : vector<128x128xf32>
    %9 = vector.shape_cast %8 : vector<128x128xf32> to vector<8x16x128xf32>
    %c0_7 = arith.constant 0 : index
    %c0_8 = arith.constant 0 : index
    %10 = vector.load %arg5[%c0_7, %c0_8] : memref<1x128xf32, #tpu.memory_space<vmem>>, vector<1x128xf32>
    %11 = vector.shape_cast %10 : vector<1x128xf32> to vector<1x1x128xf32>
    %12 = vector.broadcast %11 : vector<1x1x128xf32> to vector<8x16x128xf32>
    %13 = arith.mulf %9, %12 : vector<8x16x128xf32>
    %cst_9 = arith.constant dense<0.000000e+00> : vector<8x16xf32>
    %14 = vector.multi_reduction <add>, %13, %cst_9 [2] : vector<8x16x128xf32> to vector<8x16xf32>
    %c0_10 = arith.constant 0 : index
    %c0_11 = arith.constant 0 : index
    %15 = memref.load %arg6[%c0_10, %c0_11] : memref<1x1xf32, #tpu.memory_space<smem>>
    %16 = vector.broadcast %15 : f32 to vector<8x16xf32>
    %17 = arith.addf %14, %16 : vector<8x16xf32>
    %c0_12 = arith.constant 0 : index
    %c0_13 = arith.constant 0 : index
    %18 = vector.load %arg2[%c0_12, %c0_13] : memref<8x16xi32, #tpu.memory_space<vmem>>, vector<8x16xi32>
    %c0_i32 = arith.constant 0 : i32
    %19 = vector.broadcast %c0_i32 : i32 to vector<8x16xi32>
    %20 = arith.cmpi sgt, %18, %19 : vector<8x16xi32>
    %cst_14 = arith.constant -1.000000e+09 : f32
    %21 = vector.broadcast %cst_14 : f32 to vector<8x16xf32>
    %22 = arith.select %20, %17, %21 : vector<8x16xi1>, vector<8x16xf32>
    %cst_15 = arith.constant dense<0xFF800000> : vector<8xf32>
    %23 = vector.multi_reduction <maximumf>, %22, %cst_15 [1] : vector<8x16xf32> to vector<8xf32>
    %24 = vector.shape_cast %23 : vector<8xf32> to vector<8x1xf32>
    %25 = vector.broadcast %24 : vector<8x1xf32> to vector<8x16xf32>
    %26 = arith.subf %22, %25 : vector<8x16xf32>
    %27 = math.exp %26 : vector<8x16xf32>
    %cst_16 = arith.constant dense<0.000000e+00> : vector<8xf32>
    %28 = vector.multi_reduction <add>, %27, %cst_16 [1] : vector<8x16xf32> to vector<8xf32>
    %29 = vector.shape_cast %28 : vector<8xf32> to vector<8x1xf32>
    %30 = vector.broadcast %29 : vector<8x1xf32> to vector<8x16xf32>
    %31 = arith.divf %27, %30 : vector<8x16xf32>
    %32 = vector.shape_cast %31 : vector<8x16xf32> to vector<8x16x1xf32>
    %33 = arith.extf %0 : vector<8x16x128xbf16> to vector<8x16x128xf32>
    %34 = vector.broadcast %32 : vector<8x16x1xf32> to vector<8x16x128xf32>
    %35 = arith.mulf %34, %33 : vector<8x16x128xf32>
    %cst_17 = arith.constant dense<0.000000e+00> : vector<8x128xf32>
    %36 = vector.multi_reduction <add>, %35, %cst_17 [1] : vector<8x16x128xf32> to vector<8x128xf32>
    %c0_18 = arith.constant 0 : index
    %c0_19 = arith.constant 0 : index
    %37 = vector.load %arg7[%c0_18, %c0_19] : memref<8x128xf32, #tpu.memory_space<vmem>>, vector<8x128xf32>
    tpu.vector_store %arg7[%c0_18, %c0_19], %36 {strides = array<i32>} : memref<8x128xf32, #tpu.memory_space<vmem>>, vector<8x128xf32>,
    return
  }
  func.func @transform_0(%arg0: i32) -> (i32, i32, i32) {
    %c0_i32 = arith.constant 0 : i32
    %c0_i32_0 = arith.constant 0 : i32
    %c0_i32_1 = arith.constant 0 : i32
    return %arg0, %c0_i32, %c0_i32_0 : i32, i32, i32
  }
  func.func @transform_1(%arg0: i32) -> (i32, i32) {
    %c0_i32 = arith.constant 0 : i32
    %c0_i32_0 = arith.constant 0 : i32
    return %arg0, %c0_i32 : i32, i32
  }
  func.func @transform_2(%arg0: i32) -> (i32, i32) {
    %c0_i32 = arith.constant 0 : i32
    %c0_i32_0 = arith.constant 0 : i32
    %c0_i32_1 = arith.constant 0 : i32
    return %c0_i32, %c0_i32_0 : i32, i32
  }
  func.func @transform_3(%arg0: i32) -> (i32, i32) {
    %c0_i32 = arith.constant 0 : i32
    %c0_i32_0 = arith.constant 0 : i32
    %c0_i32_1 = arith.constant 0 : i32
    return %c0_i32, %c0_i32_0 : i32, i32
  }
  func.func @transform_4(%arg0: i32) -> (i32, i32) {
    %c0_i32 = arith.constant 0 : i32
    %c0_i32_0 = arith.constant 0 : i32
    %c0_i32_1 = arith.constant 0 : i32
    return %c0_i32, %c0_i32_0 : i32, i32
  }
  func.func @transform_5(%arg0: i32) -> (i32, i32) {
    %c0_i32 = arith.constant 0 : i32
    %c0_i32_0 = arith.constant 0 : i32
    %c0_i32_1 = arith.constant 0 : i32
    return %c0_i32, %c0_i32_0 : i32, i32
  }
  func.func @transform_6(%arg0: i32) -> (i32, i32) {
    %c0_i32 = arith.constant 0 : i32
    %c0_i32_0 = arith.constant 0 : i32
    return %arg0, %c0_i32 : i32, i32
  }
}

</mosaic_0001>

<bundles_post_ra>
// kernel: tpu_custom_call.1
= control target key start
LH: loop header
LB: loop body
LE: loop exit
PB: predicated region body
PF: predicated region fallthrough
CT: control target
= control target key end

     0   :  { %12 = vsyncpa [#allocation4], 0  ;;  %s1014_s0 = inlined_call_operand.hbm [shape: bf16[8,16,128], index: 0, kind: input, shape index: {}]   ;;  %s1015_s1 = inlined_call_operand.hbm [shape: s32[8,16], index: 1, kind: input, shape index: {}]   ;;  %s1016_s2 = inlined_call_operand.hbm [shape: bf16[128,128], index: 2, kind: input, shape index: {}]   ;;  %s1017_s3 = inlined_call_operand.vmem [shape: f32[1,128], index: 3, kind: input, shape index: {}]   ;;  %s1018_s4 = inlined_call_operand.vmem [shape: f32[1,128], index: 4, kind: input, shape index: {}]   ;;  %s1019_s5 = inlined_call_operand.<no memory space> [shape: f32[1,1], index: 5, kind: input, shape index: {}]   ;;  %s1020_s6 = inlined_call_operand.hbm [shape: f32[8,128], index: 6, kind: output, shape index: {}]  }
   0x1   :  { %13 = vsyncpa [#allocation7], 0  ;;  %s33_s23 = sshll.u32 %s1015_s1, 4  ;;  %s34_s23 = int_to_ptr.hbm [resolvable:$true] %s33_s23 }
   0x2   :  { %14 = vsyncpa [#allocation5], 0  ;;  %s881_s24 = smov [#allocation6]   ;;  %s19_s28 = sshll.u32 %s1014_s0, 4  ;;  %s20_s28 = int_to_ptr.hbm [resolvable:$true] %s19_s28 }
   0x3   :  { %s35_s25 = sshll.u32 %s881_s24, 4  ;;  %s882_s29 = smov [#allocation3]   ;;  %s36_s25 = int_to_ptr.vmem [resolvable:$true] %s35_s25 }
   0x4   :  { %38 = dma.hbm_to_vmem [thread:$0]  %s34_s23, 128, %s36_s25, [#allocation7]  }
   0x5   :  { %s21_s30 = sshll.u32 %s882_s29, 4  ;;  %s883_s7 = smov 64   ;;  %s22_s30 = int_to_ptr.vmem [resolvable:$true] %s21_s30 }
   0x6   :  { %s884_s8 = smov 4   ;;  %s43_s1 = sshll.u32 %s1016_s2, 4  ;;  %s44_s1 = int_to_ptr.hbm [resolvable:$true] %s43_s1 }
   0x7   :  { %27 = dma.hbm_to_vmem [thread:$0]  %s20_s28, 1024, %s22_s30, [#allocation4], %s883_s7, %s883_s7, %s884_s8  }
   0x8   :  { %s885_s11 = smov [#allocation8]  }
   0x9   :  { %s45_s12 = sshll.u32 %s885_s11, 4  ;;  %s46_s12 = int_to_ptr.vmem [resolvable:$true] %s45_s12 }
   0xa   :  { %51 = dma.hbm_to_vmem [thread:$0]  %s44_s1, 1024, %s46_s12, [#allocation7], %s883_s7, %s883_s7, %s884_s8  }
   0xb   :  { %875 = dma.done.wait [#allocation4], 1024  }
   0xc   :  { %876 = vsyncadd [#allocation4], 4294966272 }
   0xd   :  { %877 = dma.done.wait [#allocation7], 1152  }
   0xe   :  { %878 = vsyncadd [#allocation7], 4294966144  ;;  %v730_v0 = vld [vmem:[#allocation8 + $0x38] sm:$0xff]  ;;  %v729_v1 = vld [vmem:[#allocation8 + $0x30] sm:$0xff]  ;;  %vm360_vm0 = vcmask 130112   ;;  %vm383_vm1 = vcmask 1041409  }
   0xf   :  { %202 = vmatpush.bf16.msra.mxu0 %v730_v0  ;;  %731 = vmatpush.bf16.msra.mxu1 %v730_v0  ;;  %v728_v2 = vld [vmem:[#allocation8 + $0x28] sm:$0xff]  ;;  %v727_v3 = vld [vmem:[#allocation8 + $0x20] sm:$0xff]  ;;  %v726_v4 = vld [vmem:[#allocation8 + $0x18] sm:$0xff]  ;;  %vm385_vm2 = vcmask 1042434   ;;  %vm387_vm3 = vcmask 1043459   ;;  %vm389_vm4 = vcmask 1044484  }
  0x10   :  { %732 = vmatpush.bf16.msra.mxu2 %v730_v0  ;;  %733 = vmatpush.bf16.msra.mxu3 %v730_v0  ;;  %v725_v5 = vld [vmem:[#allocation8 + $0x10] sm:$0xff]  ;;  %v724_v6 = vld [vmem:[#allocation8 + $0x8] sm:$0xff]  ;;  %v723_v7 = vld [vmem:[#allocation8] sm:$0xff]  ;;  %vm391_vm5 = vcmask 1045509   ;;  %vm393_vm6 = vcmask 1046534   ;;  %vm395_vm7 = vcmask 1047559  }
  0x11   :  { %v715_v8 = vld [vmem:[#allocation3] sm:$0xff]  ;;  %v717_v9 = vld [vmem:[#allocation3 + $0x10] sm:$0xff]  ;;  %v716_v12 = vld [vmem:[#allocation3 + $0x8] sm:$0xff]  ;;  %vm399_vm9 = vcmask 130048   ;;  %s640_s18 = sshll.u32 %s1020_s6, 4  ;;  %s641_s18 = int_to_ptr.hbm [resolvable:$true] %s640_s18 }
  0x12   :  { %v719_v10 = vld [vmem:[#allocation3 + $0x20] sm:$0xff]  ;;  %v721_v11 = vld [vmem:[#allocation3 + $0x30] sm:$0xff]  ;;  %v718_v13 = vld [vmem:[#allocation3 + $0x18] sm:$0xff] }
  0x13   :  { %203 = vmatpush.bf16.msra.mxu0 %v729_v1  ;;  %734 = vmatpush.bf16.msra.mxu1 %v729_v1  ;;  %v720_v14 = vld [vmem:[#allocation3 + $0x28] sm:$0xff]  ;;  %v722_v15 = vld [vmem:[#allocation3 + $0x38] sm:$0xff]  ;;  %v934_v16 = vld [vmem:[%s1017_s3] ss:$0 sm:$0xff] }
  0x14   :  { %735 = vmatpush.bf16.msra.mxu2 %v729_v1  ;;  %736 = vmatpush.bf16.msra.mxu3 %v729_v1  ;;  %v941_v21 = vld [vmem:[%s1018_s4] ss:$0 sm:$0xff] }
  0x17   :  { %204 = vmatpush.bf16.msra.mxu0 %v728_v2  ;;  %737 = vmatpush.bf16.msra.mxu1 %v728_v2 }
  0x18   :  { %738 = vmatpush.bf16.msra.mxu2 %v728_v2  ;;  %739 = vmatpush.bf16.msra.mxu3 %v728_v2 }
  0x1b   :  { %205 = vmatpush.bf16.msra.mxu0 %v727_v3  ;;  %740 = vmatpush.bf16.msra.mxu1 %v727_v3 }
  0x1c   :  { %741 = vmatpush.bf16.msra.mxu2 %v727_v3  ;;  %742 = vmatpush.bf16.msra.mxu3 %v727_v3 }
  0x1f   :  { %206 = vmatpush.bf16.msra.mxu0 %v726_v4  ;;  %743 = vmatpush.bf16.msra.mxu1 %v726_v4 }
  0x20   :  { %744 = vmatpush.bf16.msra.mxu2 %v726_v4  ;;  %745 = vmatpush.bf16.msra.mxu3 %v726_v4 }
  0x23   :  { %207 = vmatpush.bf16.msra.mxu0 %v725_v5  ;;  %746 = vmatpush.bf16.msra.mxu1 %v725_v5 }
  0x24   :  { %747 = vmatpush.bf16.msra.mxu2 %v725_v5  ;;  %748 = vmatpush.bf16.msra.mxu3 %v725_v5 }
  0x27   :  { %208 = vmatpush.bf16.msra.mxu0 %v724_v6  ;;  %749 = vmatpush.bf16.msra.mxu1 %v724_v6 }
  0x28   :  { %750 = vmatpush.bf16.msra.mxu2 %v724_v6  ;;  %751 = vmatpush.bf16.msra.mxu3 %v724_v6 }
  0x2b   :  { %209 = vmatpush.bf16.msra.mxu0 %v723_v7  ;;  %752 = vmatpush.bf16.msra.mxu1 %v723_v7 }
  0x2c   :  { %753 = vmatpush.bf16.msra.mxu2 %v723_v7  ;;  %754 = vmatpush.bf16.msra.mxu3 %v723_v7 }
  0x2e   :  { %210 = vmatmul.bf16.vlgmr.msra.gmra.mxu0 %v715_v8  ;;  %220 = vmatmul.bf16.vlgmr.msra.gmra.mxu1 %v717_v9 }
  0x2f   :  { %230 = vmatmul.bf16.vlgmr.msra.gmra.mxu2 %v719_v10  ;;  %240 = vmatmul.bf16.vlgmr.msra.gmra.mxu3 %v721_v11 }
  0x3e   :  { %215 = vmatmul.bf16.gmra.mxu0 %v716_v12  ;;  %225 = vmatmul.bf16.gmra.mxu1 %v718_v13 }
  0x3f   :  { %235 = vmatmul.bf16.gmra.mxu2 %v720_v14  ;;  %245 = vmatmul.bf16.gmra.mxu3 %v722_v15 }
  0xab   :  { %v211_v17 = vpop.f32.mrf.mxu0  ;;  %v221_v18 = vpop.f32.mrf.mxu1 }
  0xac   :  { %v212_v19 = vadd.f32 %v934_v16, %v211_v17  ;;  %v222_v20 = vadd.f32 %v934_v16, %v221_v18 }
  0xae   :  { %v251_v22 = vmax.f32 %v212_v19, 0.0  ;;  %v255_v23 = vmax.f32 %v222_v20, 0.0 }
  0xb0   :  { %v275_v24 = vmul.f32 %v941_v21, %v255_v23  ;;  %v271_v25 = vmul.f32 %v941_v21, %v251_v22 }
  0xb2   :  { %v231_v26 = vpop.f32.mrf.mxu2  ;;  %295 = vadd.xlane.f32.xlu2 %v275_v24  ;;  %287 = vadd.xlane.f32.xlu0 %v271_v25  ;;  %v241_v27 = vpop.f32.mrf.mxu3 }
  0xb3   :  { %v232_v28 = vadd.f32 %v934_v16, %v231_v26  ;;  %v213_v29 = vpop.f32.mrf.mxu0  ;;  %v242_v30 = vadd.f32 %v934_v16, %v241_v27  ;;  %v223_v31 = vpop.f32.mrf.mxu1 }
  0xb4   :  { %v224_v34 = vadd.f32 %v934_v16, %v223_v31  ;;  %v214_v37 = vadd.f32 %v934_v16, %v213_v29  ;;  %v355_v29 = vlaneseq }
  0xb5   :  { %v259_v32 = vmax.f32 %v232_v28, 0.0  ;;  %v263_v33 = vmax.f32 %v242_v30, 0.0 }
  0xb6   :  { %v256_v39 = vmax.f32 %v224_v34, 0.0  ;;  %v252_v43 = vmax.f32 %v214_v37, 0.0  ;;  %v977_v30 = vand.u32 127, %v355_v29 }
  0xb7   :  { %v279_v35 = vmul.f32 %v941_v21, %v259_v32  ;;  %v283_v36 = vmul.f32 %v941_v21, %v263_v33 }
  0xb8   :  { %v276_v45 = vmul.f32 %v941_v21, %v256_v39  ;;  %v272_v48 = vmul.f32 %v941_v21, %v252_v43  ;;  %v358_v33 = vadd.s32 4294967288, %v977_v30 }
  0xba   :  { %v233_v38 = vpop.f32.mrf.mxu2  ;;  %303 = vadd.xlane.f32.xlu2 %v279_v35  ;;  %311 = vadd.xlane.f32.xlu0 %v283_v36  ;;  %v243_v40 = vpop.f32.mrf.mxu3 }
  0xbb   :  { %v216_v41 = vpop.f32.mrf.mxu0  ;;  %v234_v47 = vadd.f32 %v934_v16, %v233_v38  ;;  %v226_v52 = vpop.f32.mrf.mxu1  ;;  %v244_v14 = vadd.f32 %v934_v16, %v243_v40 }
  0xbc   :  { %v217_v42 = vadd.f32 %v934_v16, %v216_v41  ;;  %v227_v56 = vadd.f32 %v934_v16, %v226_v52 }
  0xbd   :  { %v260_v53 = vmax.f32 %v234_v47, 0.0  ;;  %v264_v17 = vmax.f32 %v244_v14, 0.0 }
  0xbe   :  { %v253_v44 = vmax.f32 %v217_v42, 0.0  ;;  %v257_v61 = vmax.f32 %v227_v56, 0.0 }
  0xbf   :  { %v280_v59 = vmul.f32 %v941_v21, %v260_v53  ;;  %v284_v18 = vmul.f32 %v941_v21, %v264_v17 }
  0xc0   :  { %v273_v46 = vmul.f32 %v941_v21, %v253_v44  ;;  %v277_v5 = vmul.f32 %v941_v21, %v257_v61 }
  0xc2   :  { %v236_v49 = vpop.f32.mrf.mxu2  ;;  %297 = vadd.xlane.f32.xlu2 %v276_v45  ;;  %291 = vadd.xlane.f32.xlu1 %v273_v46  ;;  %v246_v50 = vpop.f32.mrf.mxu3 }
  0xc3   :  { %v237_v51 = vadd.f32 %v934_v16, %v236_v49  ;;  %289 = vadd.xlane.f32.xlu0 %v272_v48  ;;  %v218_v55 = vpop.f32.mrf.mxu0  ;;  %v228_v2 = vpop.f32.mrf.mxu1  ;;  %v247_v3 = vadd.f32 %v934_v16, %v246_v50 }
  0xc4   :  { %v219_v58 = vadd.f32 %v934_v16, %v218_v55  ;;  %v229_v7 = vadd.f32 %v934_v16, %v228_v2 }
  0xc5   :  { %v261_v54 = vmax.f32 %v237_v51, 0.0  ;;  %v265_v9 = vmax.f32 %v247_v3, 0.0 }
  0xc6   :  { %v254_v63 = vmax.f32 %v219_v58, 0.0  ;;  %v258_v11 = vmax.f32 %v229_v7, 0.0 }
  0xc7   :  { %v281_v57 = vmul.f32 %v941_v21, %v261_v54  ;;  %v285_v12 = vmul.f32 %v941_v21, %v265_v9 }
  0xc8   :  { %v274_v8 = vmul.f32 %v941_v21, %v254_v63  ;;  %v278_v15 = vmul.f32 %v941_v21, %v258_v11 }
  0xca   :  { %v238_v60 = vpop.f32.mrf.mxu2  ;;  %307 = vadd.xlane.f32.xlu1 %v281_v57  ;;  %v248_v0 = vpop.f32.mrf.mxu3 }
  0xcb   :  { %v239_v62 = vadd.f32 %v934_v16, %v238_v60  ;;  %305 = vadd.xlane.f32.xlu0 %v280_v59  ;;  %v249_v6 = vadd.f32 %v934_v16, %v248_v0  ;;  %v320_v16 = vstv %s1019_s5  ;;  %s886_s5 = smov [#allocation9]  }
  0xcc   :  { %s638_s15 = sshll.u32 %s886_s5, 4  ;;  %s639_s15 = int_to_ptr.vmem [resolvable:$true] %s638_s15 }
  0xcd   :  { %v262_v1 = vmax.f32 %v239_v62, 0.0  ;;  %v266_v10 = vmax.f32 %v249_v6, 0.0 }
  0xcf   :  { %v282_v4 = vmul.f32 %v941_v21, %v262_v1  ;;  %v286_v13 = vmul.f32 %v941_v21, %v266_v10 }
  0xd1   :  { %309 = vadd.xlane.f32.xlu2 %v282_v4 }
  0xd2   :  { %293 = vadd.xlane.f32.xlu1 %v274_v8 }
  0xd3   :  { %299 = vadd.xlane.f32.xlu0 %v277_v5 }
  0xd9   :  { %315 = vadd.xlane.f32.xlu2 %v285_v12  ;;  %v337_v12 = vld [vmem:[#allocation6] sm:$0xff] }
  0xda   :  { %301 = vadd.xlane.f32.xlu1 %v278_v15  ;;  %vm338_vm8 = vcmp.gt.s32.totalorder %v337_v12, 0 }
  0xdb   :  { %317 = vadd.xlane.f32.xlu0 %v286_v13 }
  0xe2   :  { %313 = vadd.xlane.f32.xlu1 %v284_v18 }
 0x125   :  { %v288_v19 = vpop.xlane.xlu0 %287  ;;  %v296_v20 = vpop.xlane.xlu2 %295 }
 0x126   :  { %v321_v37 = vadd.f32 %v320_v16, %v288_v19  ;;  %v325_v39 = vadd.f32 %v320_v16, %v296_v20 }
 0x128   :  { %v357_v44 = vperm.slane %v321_v37, %v977_v30  ;;  %v365_v47 = vperm.slane %v325_v39, %v977_v30 }
 0x12d   :  { %v312_v22 = vpop.xlane.xlu0 %311  ;;  %v304_v24 = vpop.xlane.xlu2 %303 }
 0x12e   :  { %v329_v52 = vadd.f32 %v320_v16, %v304_v24  ;;  %v333_v3 = vadd.f32 %v320_v16, %v312_v22 }
 0x130   :  { %v371_v2 = vperm.slane %v329_v52, %v977_v30  ;;  %v377_v14 = vperm.slane %v333_v3, %v977_v30 }
 0x135   :  { %v292_v23 = vpop.xlane.xlu1 %291  ;;  %v298_v28 = vpop.xlane.xlu2 %297 }
 0x136   :  { %v290_v25 = vpop.xlane.xlu0 %289  ;;  %v323_v34 = vadd.f32 %v320_v16, %v292_v23  ;;  %v326_v40 = vadd.f32 %v320_v16, %v298_v28 }
 0x137   :  { %v322_v35 = vadd.f32 %v320_v16, %v290_v25 }
 0x138   :  { %v362_v41 = vperm.slane %v323_v34, %v977_v30  ;;  %v366_v48 = vperm.slane %v326_v40, %v358_v33 }
 0x139   :  { %v359_v42 = vperm.slane %v322_v35, %v358_v33 }
 0x13a   :  { %v367_v59 = vsel %vm360_vm0, %v366_v48, %v365_v47 }
 0x13b   :  { %v361_v51 = vsel %vm360_vm0, %v359_v42, %v357_v44 }
 0x13d   :  { %v308_v26 = vpop.xlane.xlu1 %307 }
 0x13e   :  { %v306_v27 = vpop.xlane.xlu0 %305  ;;  %v331_v62 = vadd.f32 %v320_v16, %v308_v26 }
 0x13f   :  { %v330_v49 = vadd.f32 %v320_v16, %v306_v27 }
 0x140   :  { %v374_v9 = vperm.slane %v331_v62, %v977_v30  ;;  %v75_v62 = vld [vmem:[#allocation3 + $0x14] sm:$0xff]  }
 0x141   :  { %v372_v60 = vperm.slane %v330_v49, %v358_v33 }
 0x143   :  { %v373_v7 = vsel %vm360_vm0, %v372_v60, %v371_v2  ;;  %v74_v60 = vld [vmem:[#allocation3 + $0x10] sm:$0xf]  ;;  %v77_v2 = vld [vmem:[#allocation3 + $0x1c] sm:$0xf] }
 0x144   :  { %v310_v36 = vpop.xlane.xlu2 %309 }
 0x145   :  { %v294_v31 = vpop.xlane.xlu1 %293  ;;  %v332_v58 = vadd.f32 %v320_v16, %v310_v36 }
 0x146   :  { %v324_v21 = vadd.f32 %v320_v16, %v294_v31  ;;  %v300_v32 = vpop.xlane.xlu0 %299  ;;  %v426_v31 = vshrl.u32 %v355_v29, 7 }
 0x147   :  { %v327_v43 = vadd.f32 %v320_v16, %v300_v32  ;;  %v375_v5 = vperm.slane %v332_v58, %v358_v33 }
 0x148   :  { %v363_v38 = vperm.slane %v324_v21, %v358_v33  ;;  %763 = vset.pattern.permute.xlu2 %v426_v31  ;;  %761 = vset.pattern.permute.xlu0 %v426_v31  ;;  %v433_v21 = vadd.s32 8, %v426_v31 }
 0x149   :  { %v368_v54 = vperm.slane %v327_v43, %v977_v30  ;;  %v376_v17 = vsel %vm360_vm0, %v375_v5, %v374_v9 }
 0x14a   :  { %v364_v45 = vsel %vm360_vm0, %v363_v38, %v362_v41  ;;  %762 = vset.pattern.permute.xlu1 %v433_v21 }
 0x14b   :  { %v384_v53 = vsel %vm383_vm1, %v364_v45, %v361_v51 }
 0x14c   :  { %v316_v56 = vpop.xlane.xlu2 %315  ;;  %v386_v63 = vsel %vm385_vm2, %v367_v59, %v384_v53  ;;  %v71_v59 = vld [vmem:[#allocation3] sm:$0xff]  }
 0x14d   :  { %v302_v46 = vpop.xlane.xlu1 %301  ;;  %v335_v0 = vadd.f32 %v320_v16, %v316_v56 }
 0x14e   :  { %v328_v50 = vadd.f32 %v320_v16, %v302_v46  ;;  %v318_v57 = vpop.xlane.xlu0 %317 }
 0x14f   :  { %v336_v1 = vadd.f32 %v320_v16, %v318_v57  ;;  %v380_v10 = vperm.slane %v335_v0, %v977_v30  ;;  %v528_v0 = vunpack.c.l.bf16 %v71_v59 }
 0x150   :  { %v369_v55 = vperm.slane %v328_v50, %v358_v33 }
 0x151   :  { %v381_v11 = vperm.slane %v336_v1, %v358_v33  ;;  %v532_v1 = vunpack.c.l.bf16 %v74_v60 }
 0x152   :  { %v370_v61 = vsel %vm360_vm0, %v369_v55, %v368_v54 }
 0x153   :  { %v388_v4 = vsel %vm387_vm3, %v370_v61, %v386_v63  ;;  %v382_v20 = vsel %vm360_vm0, %v381_v11, %v380_v10  ;;  %v72_v61 = vld [vmem:[#allocation3 + $0x8] sm:$0xff]   ;;  %v529_v63 = vunpack.c.h.bf16 %v71_v59  ;;  %v85_v59 = vld [vmem:[#allocation3 + $0x38] sm:$0xff]  }
 0x154   :  { %v390_v13 = vsel %vm389_vm4, %v373_v7, %v388_v4  ;;  %v531_v3 = vunpack.c.h.bf16 %v72_v61  ;;  %v78_v4 = vld [vmem:[#allocation3 + $0x20] sm:$0xff]   ;;  %v530_v7 = vunpack.c.l.bf16 %v72_v61 }
 0x155   :  { %v314_v6 = vpop.xlane.xlu1 %313  ;;  %v392_v19 = vsel %vm391_vm5, %v376_v17, %v390_v13  ;;  %v537_v9 = vunpack.c.h.bf16 %v78_v4  ;;  %v535_v13 = vunpack.c.l.bf16 %v77_v2  ;;  %v542_v2 = vunpack.c.l.bf16 %v85_v59 }
 0x156   :  { %v334_v8 = vadd.f32 %v320_v16, %v314_v6  ;;  %v534_v6 = vunpack.c.h.bf16 %v75_v62 }
 0x158   :  { %v378_v15 = vperm.slane %v334_v8, %v358_v33  ;;  %v533_v8 = vunpack.c.l.bf16 %v75_v62 }
 0x15a   :  { %v379_v18 = vsel %vm360_vm0, %v378_v15, %v377_v14  ;;  %v536_v15 = vunpack.c.l.bf16 %v78_v4 }
 0x15b   :  { %v394_v22 = vsel %vm393_vm6, %v379_v18, %v392_v19  ;;  %v80_v18 = vld [vmem:[#allocation3 + $0x28] sm:$0xff]  }
 0x15c   :  { %v396_v23 = vsel %vm395_vm7, %v382_v20, %v394_v22 }
 0x15d   :  { %v398_v24 = vsel %vm338_vm8, %v396_v23, -1e+09 }
 0x15e   :  { %v400_v25 = vsel %vm399_vm9, %v398_v24, -inf }
 0x15f   :  { %401 = vmax.xlane.f32.xlu1 %v400_v25 }
 0x1d2   :  { %v402_v26 = vpop.xlane.xlu1 %401 }
 0x1d3   :  { %v403_v27 = vsub.f32 %v398_v24, %v402_v26 }
 0x1d5   :  { %v404_v28 = vmul.f32 1.442695, %v403_v27  ;;  %v538_v27 = vunpack.c.l.bf16 %v80_v18 }
 0x1d7   :  { %775 = vpow2.f32 %v404_v28  ;;  %v82_v28 = vld [vmem:[#allocation3 + $0x30] sm:$0xff]  }
 0x1dd   :  { %v776_v16 = vpop.eup %775 }
 0x1de   :  { %v406_v30 = vsel %vm399_vm9, %v776_v16, 0.0 }
 0x1df   :  { %407 = vadd.xlane.f32.xlu2 %v406_v30 }
 0x252   :  { %v408_v32 = vpop.xlane.xlu2 %407 }
 0x253   :  { %777 = vrcp.f32 %v408_v32  ;;  %v420_v36 = vand.u32 2147483648, %v408_v32  ;;  %v418_v38 = vand.u32 2147483647, %v408_v32  ;;  %vm414_vm11 = vweird.f32 %v408_v32 }
 0x255   :  { %v421_v40 = vor.u32 1.1754944e-38, %v420_v36  ;;  %vm419_vm13 = vcmp.eq.f32.partialorder %v418_v38, 8.507059e+37 }
 0x259   :  { %v778_v33 = vpop.eup %777 }
 0x25a   :  { %v410_v34 = vmul.f32 %v778_v33, %v408_v32  ;;  %vm415_vm10 = vweird.f32 %v778_v33 }
 0x25b   :  { %vm416_vm12 = vmor %vm414_vm11, %vm415_vm10 }
 0x25c   :  { %v411_v35 = vsub.f32 1.0, %v410_v34 }
 0x25e   :  { %v412_v37 = vmul.f32 %v778_v33, %v411_v35  ;;  %v540_v35 = vunpack.c.l.bf16 %v82_v28 }
 0x260   :  { %v413_v39 = vadd.f32 %v778_v33, %v412_v37 }
 0x262   :  { %v417_v41 = vsel %vm416_vm12, %v778_v33, %v413_v39 }
 0x263   :  { %v422_v29 = vsel %vm419_vm13, %v421_v40, %v417_v41 }
 0x264   :  { %v423_v42 = vmul.f32 %v776_v16, %v422_v29  ;;  %v539_v16 = vunpack.c.h.bf16 %v80_v18 }
 0x266   :  { %v437_v43 = vperm.slane %v423_v42, 1  ;;  %v424_v44 = vperm.slane %v423_v42, 0  ;;  %v450_v45 = vperm.slane %v423_v42, 2  ;;  %v463_v46 = vperm.slane %v423_v42, 3 }
 0x267   :  { %v502_v47 = vperm.slane %v423_v42, 6  ;;  %v476_v48 = vperm.slane %v423_v42, 4  ;;  %v489_v49 = vperm.slane %v423_v42, 5  ;;  %v515_v50 = vperm.slane %v423_v42, 7 }
 0x268   :  { %442 = vperm.xlu2 %763, %v437_v43   ;;  %435 = vperm.xlu1 %762, %v424_v44  }
 0x269   :  { %429 = vperm.xlu0 %761, %v424_v44  }
 0x270   :  { %764 = vset.pattern.permute.xlu2 %v433_v21  ;;  %765 = vset.pattern.permute.xlu1 %v426_v31 }
 0x271   :  { %766 = vset.pattern.permute.xlu0 %v433_v21 }
 0x278   :  { %448 = vperm.xlu2 %764, %v437_v43   ;;  %455 = vperm.xlu1 %765, %v450_v45  }
 0x279   :  { %474 = vperm.xlu0 %766, %v463_v46  }
 0x280   :  { %461 = vperm.xlu2 %764, %v450_v45   ;;  %468 = vperm.xlu1 %765, %v463_v46  }
 0x281   :  { %769 = vset.pattern.permute.xlu0 %v426_v31 }
 0x288   :  { %767 = vset.pattern.permute.xlu2 %v426_v31  ;;  %768 = vset.pattern.permute.xlu1 %v433_v21 }
 0x289   :  { %507 = vperm.xlu0 %769, %v502_v47  }
 0x290   :  { %481 = vperm.xlu2 %767, %v476_v48   ;;  %487 = vperm.xlu1 %768, %v476_v48  }
 0x291   :  { %772 = vset.pattern.permute.xlu0 %v433_v21 }
 0x298   :  { %494 = vperm.xlu2 %767, %v489_v49   ;;  %500 = vperm.xlu1 %768, %v489_v49  }
 0x2a0   :  { %770 = vset.pattern.permute.xlu2 %v433_v21  ;;  %771 = vset.pattern.permute.xlu1 %v426_v31  ;;  %v541_v21 = vunpack.c.h.bf16 %v82_v28 }
 0x2a8   :  { %513 = vperm.xlu2 %770, %v502_v47   ;;  %520 = vperm.xlu1 %771, %v515_v50  }
 0x2b0   :  { %526 = vperm.xlu2 %770, %v515_v50  }
 0x2c2   :  { %v443_v51 = vpop.permute.xlu2 %442 }
 0x2c3   :  { %v546_v22 = vmul.f32 %v530_v7, %v443_v51 }
 0x2d2   :  { %v449_v52 = vpop.permute.xlu2 %448 }
 0x2d3   :  { %v547_v19 = vmul.f32 %v531_v3, %v449_v52 }
 0x2d5   :  { %v567_v32 = vadd.f32 %v547_v19, %v546_v22 }
 0x2d7   :  { %v568_v43 = vrot.slane %v567_v32, 4 }
 0x2d9   :  { %v569_v52 = vadd.f32 %v568_v43, %v567_v32 }
 0x2da   :  { %v436_v53 = vpop.permute.xlu1 %435  ;;  %v462_v54 = vpop.permute.xlu2 %461 }
 0x2db   :  { %v430_v58 = vpop.permute.xlu0 %429  ;;  %v545_v11 = vmul.f32 %v529_v63, %v436_v53  ;;  %v549_v23 = vmul.f32 %v533_v8, %v462_v54  ;;  %v570_v60 = vrot.slane %v569_v52, 2 }
 0x2dc   :  { %v544_v12 = vmul.f32 %v528_v0, %v430_v58  ;;  %v543_v0 = vunpack.c.h.bf16 %v85_v59 }
 0x2de   :  { %v560_v25 = vadd.f32 %v545_v11, %v544_v12 }
 0x2e0   :  { %v561_v38 = vrot.slane %v560_v25, 4 }
 0x2e2   :  { %v562_v48 = vadd.f32 %v561_v38, %v560_v25 }
 0x2ea   :  { %v456_v55 = vpop.permute.xlu1 %455  ;;  %v482_v56 = vpop.permute.xlu2 %481 }
 0x2eb   :  { %v475_v14 = vpop.permute.xlu0 %474  ;;  %v548_v17 = vmul.f32 %v532_v1, %v456_v55  ;;  %v552_v30 = vmul.f32 %v536_v15, %v482_v56  ;;  %v563_v55 = vrot.slane %v562_v48, 2 }
 0x2ec   :  { %v551_v26 = vmul.f32 %v535_v13, %v475_v14 }
 0x2ed   :  { %v574_v31 = vadd.f32 %v549_v23, %v548_v17  ;;  %v564_v63 = vadd.f32 %v563_v55, %v562_v48 }
 0x2ef   :  { %v575_v29 = vrot.slane %v574_v31, 4 }
 0x2f1   :  { %v576_v50 = vadd.f32 %v575_v29, %v574_v31 }
 0x2f2   :  { %v469_v57 = vpop.permute.xlu1 %468  ;;  %v495_v5 = vpop.permute.xlu2 %494 }
 0x2f3   :  { %v550_v20 = vmul.f32 %v534_v6, %v469_v57  ;;  %v554_v39 = vmul.f32 %v538_v27, %v495_v5  ;;  %v577_v57 = vrot.slane %v576_v50, 2  ;;  %v571_v6 = vadd.f32 %v570_v60, %v569_v52 }
 0x2f5   :  { %v581_v33 = vadd.f32 %v551_v26, %v550_v20  ;;  %v578_v3 = vadd.f32 %v577_v57, %v576_v50  ;;  %v572_v17 = vrot.slane %v571_v6, 1 }
 0x2f7   :  { %v582_v44 = vrot.slane %v581_v33, 4  ;;  %v579_v14 = vrot.slane %v578_v3, 1  ;;  %v573_v27 = vadd.f32 %v572_v17, %v571_v6 }
 0x2f9   :  { %v583_v53 = vadd.f32 %v582_v44, %v581_v33  ;;  %v580_v25 = vadd.f32 %v579_v14, %v578_v3 }
 0x2fb   :  { %v508_v40 = vpop.permute.xlu0 %507  ;;  %v584_v61 = vrot.slane %v583_v53, 2 }
 0x2fc   :  { %v556_v46 = vmul.f32 %v540_v35, %v508_v40 }
 0x2fd   :  { %v585_v7 = vadd.f32 %v584_v61, %v583_v53 }
 0x2ff   :  { %v586_v18 = vrot.slane %v585_v7, 1 }
 0x301   :  { %v587_v28 = vadd.f32 %v586_v18, %v585_v7 }
 0x302   :  { %v488_v10 = vpop.permute.xlu1 %487  ;;  %v514_v34 = vpop.permute.xlu2 %513 }
 0x303   :  { %v553_v24 = vmul.f32 %v537_v9, %v488_v10  ;;  %v557_v42 = vmul.f32 %v541_v21, %v514_v34  ;;  %v565_v10 = vrot.slane %v564_v63, 1 }
 0x305   :  { %v588_v36 = vadd.f32 %v553_v24, %v552_v30  ;;  %v602_v51 = vadd.f32 %v557_v42, %v556_v46  ;;  %v566_v22 = vadd.f32 %v565_v10, %v564_v63 }
 0x307   :  { %v589_v47 = vrot.slane %v588_v36, 4  ;;  %v603_v58 = vrot.slane %v602_v51, 4  ;;  %v624_v31 = vsel %vm383_vm1, %v573_v27, %v566_v22 }
 0x308   :  { %v625_v33 = vsel %vm385_vm2, %v580_v25, %v624_v31 }
 0x309   :  { %v590_v54 = vadd.f32 %v589_v47, %v588_v36  ;;  %v604_v4 = vadd.f32 %v603_v58, %v602_v51  ;;  %v626_v35 = vsel %vm387_vm3, %v587_v28, %v625_v33 }
 0x30a   :  { %v501_v37 = vpop.permute.xlu1 %500  ;;  %v527_v5 = vpop.permute.xlu2 %526 }
 0x30b   :  { %v555_v41 = vmul.f32 %v539_v16, %v501_v37  ;;  %v591_v62 = vrot.slane %v590_v54, 2  ;;  %v559_v11 = vmul.f32 %v543_v0, %v527_v5  ;;  %v605_v15 = vrot.slane %v604_v4, 2 }
 0x30d   :  { %v595_v45 = vadd.f32 %v555_v41, %v554_v39  ;;  %v592_v8 = vadd.f32 %v591_v62, %v590_v54  ;;  %v606_v26 = vadd.f32 %v605_v15, %v604_v4 }
 0x30f   :  { %v596_v49 = vrot.slane %v595_v45, 4  ;;  %v593_v20 = vrot.slane %v592_v8, 1  ;;  %v607_v34 = vrot.slane %v606_v26, 1 }
 0x311   :  { %v597_v56 = vadd.f32 %v596_v49, %v595_v45  ;;  %v594_v30 = vadd.f32 %v593_v20, %v592_v8  ;;  %v608_v40 = vadd.f32 %v607_v34, %v606_v26 }
 0x313   :  { %v598_v1 = vrot.slane %v597_v56, 2  ;;  %v627_v37 = vsel %vm389_vm4, %v594_v30, %v626_v35 }
 0x315   :  { %v599_v12 = vadd.f32 %v598_v1, %v597_v56 }
 0x317   :  { %v600_v23 = vrot.slane %v599_v12, 1 }
 0x319   :  { %v601_v21 = vadd.f32 %v600_v23, %v599_v12 }
 0x31a   :  { %v521_v9 = vpop.permute.xlu1 %520 }
 0x31b   :  { %v558_v13 = vmul.f32 %v542_v2, %v521_v9  ;;  %v628_v39 = vsel %vm391_vm5, %v601_v21, %v627_v37 }
 0x31c   :  { %v629_v29 = vsel %vm393_vm6, %v608_v40, %v628_v39 }
 0x31d   :  { %v609_v19 = vadd.f32 %v559_v11, %v558_v13 }
 0x31f   :  { %v610_v24 = vrot.slane %v609_v19, 4 }
 0x321   :  { %v611_v16 = vadd.f32 %v610_v24, %v609_v19 }
 0x323   :  { %v612_v32 = vrot.slane %v611_v16, 2 }
 0x325   :  { %v613_v36 = vadd.f32 %v612_v32, %v611_v16 }
 0x327   :  { %v614_v38 = vrot.slane %v613_v36, 1 }
 0x329   :  { %v615_v41 = vadd.f32 %v614_v38, %v613_v36 }
 0x32b   :  { %v630_v42 = vsel %vm395_vm7, %v615_v41, %v629_v29 }
 0x32c   :  { %632 = vst [vmem:[#allocation9] sm:$0xff] %v630_v42 }
 0x32d   :  { %643 = dma.vmem_to_hbm [thread:$0]  %s639_s15, 128, %s641_s18, [#allocation5]  }
 0x32e   :  { %879 = dma.done.wait [#allocation5], 128  }
 0x32f   :  { %880 = vsyncadd [#allocation5], 4294967168 }
 0x330   :  { %648 = vsyncpa [#allocation4], 1 }
 0x331   :  { %649 = vsyncpa [#allocation7], 1 }
 0x332   :  { %650 = vsyncpa [#allocation5], 1 }

</bundles_post_ra>
